<compile_context>
chip_gen: v7x
topology: tpu7x:2x2x1
jax: 0.10.0
libtpu: 0.0.40
codegen_flags: <defaults>
</compile_context>

<pallas_src>
import jax
import jax.numpy as jnp
from jax.experimental import pallas as pl
from jax.experimental.pallas import tpu as pltpu

_TB = 2048  # batch rows per grid step (sublane axis)


def _mlp_kernel(x_ref, w1_ref, b1_ref, w2_ref, b2_ref, w3_ref, b3_ref, o_ref):
    """One batch tile of the 3-layer MLP, contractions on the MXU.

    x_ref : (TB, 12) f32 VMEM tile   (batch on sublanes, features on lanes)
    wN_ref: (in, out) bf16 VMEM      (torch weight already transposed)
    bN_ref: (1, out)  f32 VMEM
    o_ref : (TB, 2)   f32 VMEM tile
    """
    f32 = jnp.float32
    bf16 = jnp.bfloat16

    x = x_ref[...].astype(bf16)                                    # (TB, 12)

    h1 = jnp.dot(x, w1_ref[...], preferred_element_type=f32)       # (TB, 9) MXU
    h1 = jnp.maximum(h1 + b1_ref[...], 0.0).astype(bf16)

    h2 = jnp.dot(h1, w2_ref[...], preferred_element_type=f32)      # (TB, 6) MXU
    h2 = jnp.maximum(h2 + b2_ref[...], 0.0).astype(bf16)

    y = jnp.dot(h2, w3_ref[...], preferred_element_type=f32)       # (TB, 2) MXU
    o_ref[...] = (y + b3_ref[...]).astype(o_ref.dtype)


@jax.jit
def feedforward(x, w1, b1, w2, b2, w3, b3):
    """x: (B, 12). Weights in torch shapes (out, in); biases (out,). Returns (B, 2)."""
    B = x.shape[0]
    x = x.astype(jnp.float32)

    # Block batch dim must be a multiple of 8 (sublane rule) OR the full batch.
    tb = _TB if B > _TB else B
    grid = (pl.cdiv(B, tb),)

    # Tiny parameters: transpose once to (in, out) so the kernel does x @ W on
    # the MXU; weights bf16 (f32 accumulate), biases (1, out) f32.
    bf16, f32 = jnp.bfloat16, jnp.float32
    w1t = w1.T.astype(bf16)
    w2t = w2.T.astype(bf16)
    w3t = w3.T.astype(bf16)
    b1r = b1.astype(f32).reshape(1, -1)
    b2r = b2.astype(f32).reshape(1, -1)
    b3r = b3.astype(f32).reshape(1, -1)

    def const_spec(shape):
        # Whole (tiny) array resident in VMEM; same block every grid step.
        return pl.BlockSpec(shape, lambda i: (0, 0))

    out = pl.pallas_call(
        _mlp_kernel,
        out_shape=jax.ShapeDtypeStruct((B, 2), jnp.float32),
        grid=grid,
        in_specs=[
            pl.BlockSpec((tb, 12), lambda i: (i, 0)),   # x tile (double-buffered)
            const_spec((12, 9)), const_spec((1, 9)),    # w1.T, b1
            const_spec((9, 6)),  const_spec((1, 6)),    # w2.T, b2
            const_spec((6, 2)),  const_spec((1, 2)),    # w3.T, b3
        ],
        out_specs=pl.BlockSpec((tb, 2), lambda i: (i, 0)),
        compiler_params=pltpu.CompilerParams(
            dimension_semantics=("parallel",),
            vmem_limit_bytes=32 * 1024 * 1024,
        ),
    )(x, w1t, b1r, w2t, b2r, w3t, b3r)

    return out


def _init_linear(key, out_features, in_features):
    # Deterministic init mimicking torch.nn.Linear default (uniform +/- 1/sqrt(fan_in)).
    kw, kb = jax.random.split(key)
    bound = 1.0 / jnp.sqrt(jnp.float32(in_features))
    w = jax.random.uniform(kw, (out_features, in_features), jnp.float32, -bound, bound)
    b = jax.random.uniform(kb, (out_features,), jnp.float32, -bound, bound)
    return w, b


def _reference_f32(x, w1, b1, w2, b2, w3, b3):
    h1 = jnp.maximum(x @ w1.T + b1, 0.0)
    h2 = jnp.maximum(h1 @ w2.T + b2, 0.0)
    return h2 @ w3.T + b3


def _reference_bf16(x, w1, b1, w2, b2, w3, b3):
    # Same math with the kernel's bf16-operand / f32-accumulate matmuls.
    bf, f32 = jnp.bfloat16, jnp.float32

    def dense(a, w, b, relu):
        y = jnp.dot(a.astype(bf), w.T.astype(bf), preferred_element_type=f32) + b
        return jnp.maximum(y, 0.0) if relu else y

    h1 = dense(x, w1, b1, True)
    h2 = dense(h1, w2, b2, True)
    return dense(h2, w3, b3, False)


if __name__ == "__main__":
    key = jax.random.PRNGKey(0)
    kx, k1, k2, k3, kx2 = jax.random.split(key, 5)

    w1, b1 = _init_linear(k1, 9, 12)
    w2, b2 = _init_linear(k2, 6, 9)
    w3, b3 = _init_linear(k3, 2, 6)

    # Small-shape check (single exact block).
    B = 64
    x = jax.random.normal(kx, (B, 12), jnp.float32)
    out = jax.block_until_ready(feedforward(x, w1, b1, w2, b2, w3, b3))
    assert out.shape == (B, 2), out.shape
    assert jnp.allclose(out, _reference_bf16(x, w1, b1, w2, b2, w3, b3),
                        atol=5e-3, rtol=5e-3), "mismatch vs bf16-matmul reference (B=64)"
    assert jnp.allclose(out, _reference_f32(x, w1, b1, w2, b2, w3, b3),
                        atol=6e-2, rtol=6e-2), "mismatch vs f32 reference (B=64)"

    # Multi-tile check with a ragged final block (exercises grid + boundary masking).
    B2 = 2 * _TB + 37
    x2 = jax.random.normal(kx2, (B2, 12), jnp.float32)
    out2 = jax.block_until_ready(feedforward(x2, w1, b1, w2, b2, w3, b3))
    assert out2.shape == (B2, 2), out2.shape
    assert jnp.allclose(out2, _reference_bf16(x2, w1, b1, w2, b2, w3, b3),
                        atol=5e-3, rtol=5e-3), "mismatch vs bf16-matmul reference (ragged)"
    assert jnp.allclose(out2, _reference_f32(x2, w1, b1, w2, b2, w3, b3),
                        atol=6e-2, rtol=6e-2), "mismatch vs f32 reference (ragged)"

    print("KERNEL_OK")
</pallas_src>

<mosaic_0001>
module attributes {stable_mosaic.version = 11 : i64} {
  func.func @_mlp_kernel(%arg0: i32, %arg1: memref<64x12xf32, #tpu.memory_space<vmem>>, %arg2: memref<12x9xbf16, #tpu.memory_space<vmem>>, %arg3: memref<1x9xf32, #tpu.memory_space<vmem>>, %arg4: memref<9x6xbf16, #tpu.memory_space<vmem>>, %arg5: memref<1x6xf32, #tpu.memory_space<vmem>>, %arg6: memref<6x2xbf16, #tpu.memory_space<vmem>>, %arg7: memref<1x2xf32, #tpu.memory_space<vmem>>, %arg8: memref<64x2xf32, #tpu.memory_space<vmem>>) attributes {dimension_semantics = [#tpu.dimension_semantics<parallel>], iteration_bounds = array<i64: 1>, scalar_prefetch = 0 : i64, scratch_operands = 0 : i64, tpu.core_type = #tpu.core_type<tc>, window_params = [{transform_indices = @transform_0, window_bounds = array<i64: 64, 12>}, {pipeline_mode = #tpu.pipeline_mode<synchronous>, transform_indices = @transform_1, window_bounds = array<i64: 12, 9>}, {pipeline_mode = #tpu.pipeline_mode<synchronous>, transform_indices = @transform_2, window_bounds = array<i64: 1, 9>}, {pipeline_mode = #tpu.pipeline_mode<synchronous>, transform_indices = @transform_3, window_bounds = array<i64: 9, 6>}, {pipeline_mode = #tpu.pipeline_mode<synchronous>, transform_indices = @transform_4, window_bounds = array<i64: 1, 6>}, {pipeline_mode = #tpu.pipeline_mode<synchronous>, transform_indices = @transform_5, window_bounds = array<i64: 6, 2>}, {pipeline_mode = #tpu.pipeline_mode<synchronous>, transform_indices = @transform_6, window_bounds = array<i64: 1, 2>}, {transform_indices = @transform_7, window_bounds = array<i64: 64, 2>}]} {
    %c0 = arith.constant 0 : index
    %c0_0 = arith.constant 0 : index
    %0 = vector.load %arg1[%c0, %c0_0] : memref<64x12xf32, #tpu.memory_space<vmem>>, vector<64x12xf32>
    %1 = arith.truncf %0 : vector<64x12xf32> to vector<64x12xbf16>
    %c0_1 = arith.constant 0 : index
    %c0_2 = arith.constant 0 : index
    %2 = vector.load %arg2[%c0_1, %c0_2] : memref<12x9xbf16, #tpu.memory_space<vmem>>, vector<12x9xbf16>
    %cst = arith.constant dense<0.000000e+00> : vector<64x9xf32>
    %3 = tpu.matmul %1, %2, %cst {dimension_numbers = #tpu.dot_dimension_numbers<[1], [0], [0], [1], [0, 0, 1, 1], [], []>} : vector<64x12xbf16>, vector<12x9xbf16>, vector<64x9xf32> -> vector<64x9xf32>
    %c0_3 = arith.constant 0 : index
    %c0_4 = arith.constant 0 : index
    %4 = vector.load %arg3[%c0_3, %c0_4] : memref<1x9xf32, #tpu.memory_space<vmem>>, vector<1x9xf32>
    %5 = vector.broadcast %4 : vector<1x9xf32> to vector<64x9xf32>
    %6 = arith.addf %3, %5 : vector<64x9xf32>
    %cst_5 = arith.constant 0.000000e+00 : f32
    %7 = vector.broadcast %cst_5 : f32 to vector<64x9xf32>
    %8 = arith.maximumf %6, %7 : vector<64x9xf32>
    %9 = arith.truncf %8 : vector<64x9xf32> to vector<64x9xbf16>
    %c0_6 = arith.constant 0 : index
    %c0_7 = arith.constant 0 : index
    %10 = vector.load %arg4[%c0_6, %c0_7] : memref<9x6xbf16, #tpu.memory_space<vmem>>, vector<9x6xbf16>
    %cst_8 = arith.constant dense<0.000000e+00> : vector<64x6xf32>
    %11 = tpu.matmul %9, %10, %cst_8 {dimension_numbers = #tpu.dot_dimension_numbers<[1], [0], [0], [1], [0, 0, 1, 1], [], []>} : vector<64x9xbf16>, vector<9x6xbf16>, vector<64x6xf32> -> vector<64x6xf32>
    %c0_9 = arith.constant 0 : index
    %c0_10 = arith.constant 0 : index
    %12 = vector.load %arg5[%c0_9, %c0_10] : memref<1x6xf32, #tpu.memory_space<vmem>>, vector<1x6xf32>
    %13 = vector.broadcast %12 : vector<1x6xf32> to vector<64x6xf32>
    %14 = arith.addf %11, %13 : vector<64x6xf32>
    %cst_11 = arith.constant 0.000000e+00 : f32
    %15 = vector.broadcast %cst_11 : f32 to vector<64x6xf32>
    %16 = arith.maximumf %14, %15 : vector<64x6xf32>
    %17 = arith.truncf %16 : vector<64x6xf32> to vector<64x6xbf16>
    %c0_12 = arith.constant 0 : index
    %c0_13 = arith.constant 0 : index
    %18 = vector.load %arg6[%c0_12, %c0_13] : memref<6x2xbf16, #tpu.memory_space<vmem>>, vector<6x2xbf16>
    %cst_14 = arith.constant dense<0.000000e+00> : vector<64x2xf32>
    %19 = tpu.matmul %17, %18, %cst_14 {dimension_numbers = #tpu.dot_dimension_numbers<[1], [0], [0], [1], [0, 0, 1, 1], [], []>} : vector<64x6xbf16>, vector<6x2xbf16>, vector<64x2xf32> -> vector<64x2xf32>
    %c0_15 = arith.constant 0 : index
    %c0_16 = arith.constant 0 : index
    %20 = vector.load %arg7[%c0_15, %c0_16] : memref<1x2xf32, #tpu.memory_space<vmem>>, vector<1x2xf32>
    %21 = vector.broadcast %20 : vector<1x2xf32> to vector<64x2xf32>
    %22 = arith.addf %19, %21 : vector<64x2xf32>
    %c0_17 = arith.constant 0 : index
    %c0_18 = arith.constant 0 : index
    %23 = vector.load %arg8[%c0_17, %c0_18] : memref<64x2xf32, #tpu.memory_space<vmem>>, vector<64x2xf32>
    tpu.vector_store %arg8[%c0_17, %c0_18], %22 {strides = array<i32>} : memref<64x2xf32, #tpu.memory_space<vmem>>, vector<64x2xf32>,
    return
  }
  func.func @transform_0(%arg0: i32) -> (i32, i32) {
    %c0_i32 = arith.constant 0 : i32
    %c0_i32_0 = arith.constant 0 : i32
    return %arg0, %c0_i32 : i32, i32
  }
  func.func @transform_1(%arg0: i32) -> (i32, i32) {
    %c0_i32 = arith.constant 0 : i32
    %c0_i32_0 = arith.constant 0 : i32
    %c0_i32_1 = arith.constant 0 : i32
    return %c0_i32, %c0_i32_0 : i32, i32
  }
  func.func @transform_2(%arg0: i32) -> (i32, i32) {
    %c0_i32 = arith.constant 0 : i32
    %c0_i32_0 = arith.constant 0 : i32
    %c0_i32_1 = arith.constant 0 : i32
    return %c0_i32, %c0_i32_0 : i32, i32
  }
  func.func @transform_3(%arg0: i32) -> (i32, i32) {
    %c0_i32 = arith.constant 0 : i32
    %c0_i32_0 = arith.constant 0 : i32
    %c0_i32_1 = arith.constant 0 : i32
    return %c0_i32, %c0_i32_0 : i32, i32
  }
  func.func @transform_4(%arg0: i32) -> (i32, i32) {
    %c0_i32 = arith.constant 0 : i32
    %c0_i32_0 = arith.constant 0 : i32
    %c0_i32_1 = arith.constant 0 : i32
    return %c0_i32, %c0_i32_0 : i32, i32
  }
  func.func @transform_5(%arg0: i32) -> (i32, i32) {
    %c0_i32 = arith.constant 0 : i32
    %c0_i32_0 = arith.constant 0 : i32
    %c0_i32_1 = arith.constant 0 : i32
    return %c0_i32, %c0_i32_0 : i32, i32
  }
  func.func @transform_6(%arg0: i32) -> (i32, i32) {
    %c0_i32 = arith.constant 0 : i32
    %c0_i32_0 = arith.constant 0 : i32
    %c0_i32_1 = arith.constant 0 : i32
    return %c0_i32, %c0_i32_0 : i32, i32
  }
  func.func @transform_7(%arg0: i32) -> (i32, i32) {
    %c0_i32 = arith.constant 0 : i32
    %c0_i32_0 = arith.constant 0 : i32
    return %arg0, %c0_i32 : i32, i32
  }
}

</mosaic_0001>

<bundles_post_ra>
// kernel: feedforward.1
= control target key start
LH: loop header
LB: loop body
LE: loop exit
PB: predicated region body
PF: predicated region fallthrough
CT: control target
= control target key end

     0   :  { %vm66_vm0 = vcmask 1045504   ;;  %vm53_vm1 = vcmask 97280   ;;  %vm174_vm2 = vcmask 1043456   ;;  %vm175_vm3 = vcmask 1044480   ;;  %s554_s1 = inlined_call_operand.vmem [shape: bf16[12,9], index: 1, kind: input, shape index: {}]   ;;  %s555_s0 = inlined_call_operand.vmem [shape: f32[64,12], index: 0, kind: input, shape index: {}]   ;;  %s556_s3 = inlined_call_operand.vmem [shape: bf16[9,6], index: 3, kind: input, shape index: {}]   ;;  %s557_s2 = inlined_call_operand.vmem [shape: f32[1,9], index: 2, kind: input, shape index: {}]   ;;  %s558_s5 = inlined_call_operand.vmem [shape: bf16[6,2], index: 5, kind: input, shape index: {}]   ;;  %s559_s4 = inlined_call_operand.vmem [shape: f32[1,6], index: 4, kind: input, shape index: {}]   ;;  %s560_s6 = inlined_call_operand.vmem [shape: f32[1,2], index: 6, kind: input, shape index: {}]   ;;  %s561_s7 = inlined_call_operand.vmem [shape: f32[64,2], index: 7, kind: output, shape index: {}]  }
   0x1   :  { %v429_v0 = vld [vmem:[%s554_s1] sm:$0x3f]   ;;  %v28_v2 = vld [vmem:[%s555_s0 + $0x8] sm:$0xff]  ;;  %v29_v3 = vld [vmem:[%s555_s0 + $0x10] sm:$0xff]  ;;  %v431_v15 = vmov 65535   ;;  %vm161_vm4 = vcmask 72704  }
   0x2   :  { %v27_v1 = vld [vmem:[%s555_s0] sm:$0xff]  ;;  %425 = vmatprep.subr.msk.bf16.mxu0 %vm66_vm0, %v429_v0  ;;  %v68_v4 = vsel %vm66_vm0, %v429_v0, 0  ;;  %v30_v6 = vld [vmem:[%s555_s0 + $0x18] sm:$0xff]  ;;  %426 = vmatprep.subr.msk.bf16.mxu1 %vm66_vm0, %v429_v0  ;;  %v32_v8 = vld [vmem:[%s555_s0 + $0x28] sm:$0xff]  ;;  %v176_v16 = vsel %vm174_vm2, 4294967295, %v431_v15  ;;  %vm279_vm5 = vcmask 1042432  }
   0x3   :  { %v35_v5 = vpack.c.bf16 %v28_v2, %v27_v1  ;;  %v31_v7 = vld [vmem:[%s555_s0 + $0x20] sm:$0xff]  ;;  %394 = vmatpush3.bf16.msra.mxu0 %v68_v4  ;;  %v36_v9 = vpack.c.bf16 %v30_v6, %v29_v3  ;;  %424 = vmatpush3.bf16.msra.mxu1 %v68_v4  ;;  %v33_v11 = vld [vmem:[%s555_s0 + $0x30] sm:$0xff]  ;;  %v34_v12 = vld [vmem:[%s555_s0 + $0x38] sm:$0xff]  ;;  %v177_v17 = vsel %vm175_vm3, %v176_v16, 0  ;;  %vm266_vm6 = vcmask 48128  }
   0x4   :  { %v37_v10 = vpack.c.bf16 %v32_v8, %v31_v7  ;;  %v38_v13 = vpack.c.bf16 %v34_v12, %v33_v11  ;;  %v430_v14 = vld [vmem:[%s556_s3] sm:$0x1f]   ;;  %vm348_vm7 = vcmask 15360  }
   0x5   :  { %395 = vmatprep.mubr.msk.bf16.mxu0 %vm53_vm1, %v35_v5  ;;  %v179_v18 = vand.u32 %v430_v14, %v177_v17  ;;  %v361_v19 = vld [vmem:[%s557_s2] ss:$0 sm:$0xff] }
   0x6   :  { %399 = vmatprep.mubr.msk.bf16.mxu1 %vm53_vm1, %v37_v10  ;;  %396 = vmatmul.mubr.msk.bf16.vlgmr.msra.gmra.mrb[0].mxu0 %vm53_vm1, %v36_v9  ;;  %v258_v48 = vld [vmem:[%s558_s5] sm:$0x7] }
   0x7   :  { %400 = vmatmul.mubr.msk.bf16.vlgmr.msra.gmra.mrb[0].mxu1 %vm53_vm1, %v38_v13  ;;  %403 = vmatprep.subr.bf16.mxu1 %v179_v18  ;;  %v281_v49 = vsel %vm279_vm5, %v258_v48, 0  ;;  %v367_v50 = vld [vmem:[%s559_s4] ss:$0 sm:$0xff] }
   0x8   :  { %404 = vmatpush3.bf16.msra.mxu1 %v179_v18  ;;  %427 = vmatprep.subr.msk.bf16.mxu0 %vm279_vm5, %v258_v48  ;;  %v373_v15 = vld [vmem:[%s560_s6] ss:$0 sm:$0xff] }
   0x9   :  { %414 = vmatpush3.bf16.msra.mxu0 %v281_v49 }
  0xd9   :  { %v397_v20 = vpop.f32.mrb[0].mxu0 }
  0xda   :  { %v401_v21 = vpop.f32.mrb[0].mxu1  ;;  %v113_v22 = vadd.f32 %v397_v20, %v361_v19  ;;  %v104_v23 = vpop.f32.mrb[1].mxu0 }
  0xdb   :  { %v129_v24 = vadd.f32 %v401_v21, %v361_v19  ;;  %v120_v25 = vpop.f32.mrb[1].mxu1  ;;  %v105_v26 = vadd.f32 %v361_v19, %v104_v23  ;;  %v398_v27 = vpop.f32.mrb[2].mxu0 }
  0xdc   :  { %v121_v28 = vadd.f32 %v361_v19, %v120_v25  ;;  %v402_v29 = vpop.f32.mrb[2].mxu1  ;;  %v116_v30 = vadd.f32 %v398_v27, %v361_v19  ;;  %v107_v31 = vpop.f32.mrb[3].mxu0  ;;  %v137_v38 = vmax.f32 %v113_v22, 0.0 }
  0xdd   :  { %v141_v32 = vmax.f32 %v129_v24, 0.0  ;;  %v132_v33 = vadd.f32 %v402_v29, %v361_v19  ;;  %v123_v34 = vpop.f32.mrb[3].mxu1  ;;  %v108_v35 = vadd.f32 %v361_v19, %v107_v31  ;;  %v135_v41 = vmax.f32 %v105_v26, 0.0 }
  0xde   :  { %v139_v36 = vmax.f32 %v121_v28, 0.0  ;;  %v124_v37 = vadd.f32 %v361_v19, %v123_v34  ;;  %v138_v39 = vmax.f32 %v116_v30, 0.0 }
  0xdf   :  { %v142_v40 = vmax.f32 %v132_v33, 0.0  ;;  %v136_v42 = vmax.f32 %v108_v35, 0.0 }
  0xe0   :  { %v140_v43 = vmax.f32 %v124_v37, 0.0  ;;  %v144_v44 = vpack.c.bf16 %v138_v39, %v137_v38 }
  0xe1   :  { %v146_v45 = vpack.c.bf16 %v142_v40, %v141_v32  ;;  %v143_v46 = vpack.c.bf16 %v136_v42, %v135_v41 }
  0xe2   :  { %v145_v47 = vpack.c.bf16 %v140_v43, %v139_v36 }
  0xe3   :  { %405 = vmatprep.mubr.msk.bf16.mxu1 %vm161_vm4, %v143_v46 }
  0xe4   :  { %406 = vmatmul.mubr.msk.bf16.vlgmr.msra.gmra.mrb[4].mxu1 %vm161_vm4, %v144_v44 }
  0xe5   :  { %409 = vmatprep.mubr.msk.bf16.mxu1 %vm161_vm4, %v145_v47 }
  0xec   :  { %410 = vmatmul.mubr.msk.bf16.gmra.mrb[8].mxu1 %vm161_vm4, %v146_v45 }
 0x1b7   :  { %v407_v51 = vpop.f32.mrb[4].mxu1 }
 0x1b8   :  { %v224_v52 = vadd.f32 %v407_v51, %v367_v50  ;;  %v215_v53 = vpop.f32.mrb[5].mxu1 }
 0x1b9   :  { %v216_v54 = vadd.f32 %v367_v50, %v215_v53  ;;  %v408_v55 = vpop.f32.mrb[6].mxu1 }
 0x1ba   :  { %v227_v56 = vadd.f32 %v408_v55, %v367_v50  ;;  %v218_v57 = vpop.f32.mrb[7].mxu1  ;;  %v248_v59 = vmax.f32 %v224_v52, 0.0 }
 0x1bb   :  { %v219_v58 = vadd.f32 %v367_v50, %v218_v57  ;;  %v246_v61 = vmax.f32 %v216_v54, 0.0 }
 0x1bc   :  { %v249_v60 = vmax.f32 %v227_v56, 0.0 }
 0x1bd   :  { %v247_v62 = vmax.f32 %v219_v58, 0.0 }
 0x1be   :  { %v255_v63 = vpack.c.bf16 %v249_v60, %v248_v59 }
 0x1bf   :  { %v254_v0 = vpack.c.bf16 %v247_v62, %v246_v61  ;;  %v411_v1 = vpop.f32.mrb[8].mxu1 }
 0x1c0   :  { %v240_v2 = vadd.f32 %v411_v1, %v367_v50  ;;  %v231_v3 = vpop.f32.mrb[9].mxu1 }
 0x1c1   :  { %v232_v4 = vadd.f32 %v367_v50, %v231_v3  ;;  %v412_v5 = vpop.f32.mrb[10].mxu1  ;;  %415 = vmatprep.mubr.msk.bf16.mxu0 %vm266_vm6, %v254_v0 }
 0x1c2   :  { %v243_v6 = vadd.f32 %v412_v5, %v367_v50  ;;  %v234_v7 = vpop.f32.mrb[11].mxu1  ;;  %416 = vmatmul.mubr.msk.bf16.vlgmr.msra.gmra.mrb[4].mxu0 %vm266_vm6, %v255_v63  ;;  %v252_v9 = vmax.f32 %v240_v2, 0.0 }
 0x1c3   :  { %v235_v8 = vadd.f32 %v367_v50, %v234_v7  ;;  %v250_v11 = vmax.f32 %v232_v4, 0.0 }
 0x1c4   :  { %v253_v10 = vmax.f32 %v243_v6, 0.0 }
 0x1c5   :  { %v251_v12 = vmax.f32 %v235_v8, 0.0 }
 0x1c6   :  { %v257_v13 = vpack.c.bf16 %v253_v10, %v252_v9 }
 0x1c7   :  { %v256_v14 = vpack.c.bf16 %v251_v12, %v250_v11 }
 0x1c9   :  { %419 = vmatprep.mubr.msk.bf16.mxu0 %vm266_vm6, %v256_v14 }
 0x1ca   :  { %420 = vmatmul.mubr.msk.bf16.gmra.mrb[8].mxu0 %vm266_vm6, %v257_v13 }
 0x295   :  { %v417_v16 = vpop.f32.mrb[4].mxu0 }
 0x296   :  { %v326_v17 = vadd.f32 %v417_v16, %v373_v15  ;;  %v317_v18 = vpop.f32.mrb[5].mxu0 }
 0x297   :  { %v318_v19 = vadd.f32 %v373_v15, %v317_v18  ;;  %v418_v20 = vpop.f32.mrb[6].mxu0 }
 0x298   :  { %351 = vst.msk [vmem:[%s561_s7 + $0x10] sm:$0xff] %vm348_vm7, %v326_v17  ;;  %v329_v21 = vadd.f32 %v418_v20, %v373_v15  ;;  %v320_v22 = vpop.f32.mrb[7].mxu0 }
 0x299   :  { %349 = vst.msk [vmem:[%s561_s7] sm:$0xff] %vm348_vm7, %v318_v19  ;;  %v321_v23 = vadd.f32 %v373_v15, %v320_v22 }
 0x29a   :  { %352 = vst.msk [vmem:[%s561_s7 + $0x18] sm:$0xff] %vm348_vm7, %v329_v21 }
 0x29b   :  { %350 = vst.msk [vmem:[%s561_s7 + $0x8] sm:$0xff] %vm348_vm7, %v321_v23 }
 0x29d   :  { %v421_v24 = vpop.f32.mrb[8].mxu0 }
 0x29e   :  { %v342_v25 = vadd.f32 %v421_v24, %v373_v15  ;;  %v333_v26 = vpop.f32.mrb[9].mxu0 }
 0x29f   :  { %v334_v27 = vadd.f32 %v373_v15, %v333_v26  ;;  %v422_v28 = vpop.f32.mrb[10].mxu0 }
 0x2a0   :  { %355 = vst.msk [vmem:[%s561_s7 + $0x30] sm:$0xff] %vm348_vm7, %v342_v25  ;;  %v345_v29 = vadd.f32 %v422_v28, %v373_v15  ;;  %v336_v30 = vpop.f32.mrb[11].mxu0 }
 0x2a1   :  { %353 = vst.msk [vmem:[%s561_s7 + $0x20] sm:$0xff] %vm348_vm7, %v334_v27  ;;  %v337_v31 = vadd.f32 %v373_v15, %v336_v30 }
 0x2a2   :  { %356 = vst.msk [vmem:[%s561_s7 + $0x38] sm:$0xff] %vm348_vm7, %v345_v29 }
 0x2a3   :  { %354 = vst.msk [vmem:[%s561_s7 + $0x28] sm:$0xff] %vm348_vm7, %v337_v31 }

</bundles_post_ra>
